<compile_context>
chip_gen: v6e
topology: v6e:2x2x1
jax: 0.10.0
libtpu: 0.0.40
codegen_flags: <defaults>
</compile_context>

<pallas_src>
import functools

import jax
import jax.numpy as jnp
from jax import lax
from jax.experimental import pallas as pl
from jax.experimental.pallas import tpu as pltpu


def _round_up(a, b):
    return -(-a // b) * b


def _round_down(a, b):
    return (a // b) * b


def _sublane_multiple(dtype):
    """Native sublane tile for the dtype: 8 (f32), 16 (bf16), 32 (int8/fp8)."""
    itemsize = jnp.dtype(dtype).itemsize
    return max(8, 32 // max(1, itemsize))


# --------------------------------------------------------------------------
# Kernels
# --------------------------------------------------------------------------
def _gather_vmem_kernel(n_tokens, ids_ref, w_ref, o_ref):
    """Gather rows of the VMEM-resident table into the output block.

    ids_ref: SMEM (n_total,) int32;  w_ref: VMEM (V, Dp);  o_ref: VMEM (T, Dp).
    """
    t_tokens = o_ref.shape[0]
    base = pl.program_id(0) * t_tokens
    n_valid = jnp.minimum(t_tokens, n_tokens - base)   # skip padded rows

    def copy_row(j, carry):
        tok = ids_ref[base + j]
        o_ref[pl.ds(j, 1), :] = w_ref[pl.ds(tok, 1), :]
        return carry

    lax.fori_loop(0, n_valid, copy_row, 0)


def _gather_hbm_kernel(n_tokens, ids_ref, w_hbm, o_ref, sem):
    """Gather rows of the HBM table into the output block via row DMAs.

    All row DMAs of the block are issued concurrently onto one shared DMA
    semaphore and drained with counted waits (all copies have equal size).
    """
    t_tokens = o_ref.shape[0]
    base = pl.program_id(0) * t_tokens
    n_valid = jnp.minimum(t_tokens, n_tokens - base)   # skip padded rows

    def row_copy(j):
        tok = ids_ref[base + j]
        return pltpu.make_async_copy(
            w_hbm.at[pl.ds(tok, 1)],     # (1, Dp) table row in HBM
            o_ref.at[pl.ds(j, 1)],       # (1, Dp) row of the output block
            sem.at[0],                   # shared semaphore
        )

    def issue(j, carry):
        row_copy(j).start()
        return carry

    def drain(j, carry):
        row_copy(j).wait()               # same descriptor shape as issued
        return carry

    lax.fori_loop(0, n_valid, issue, 0)
    lax.fori_loop(0, n_valid, drain, 0)


# --------------------------------------------------------------------------
# Wrapper
# --------------------------------------------------------------------------
def _embed_tokens(ids, weight, *, t_tokens, use_vmem_table, vmem_limit_bytes):
    """Embed one flat chunk of token ids. ids: (n,) int32 in [0, V)."""
    n_tokens = ids.shape[0]
    vocab_size, d_pad = weight.shape

    n_total = _round_up(n_tokens, t_tokens)
    if n_total != n_tokens:
        ids = jnp.concatenate([ids, jnp.zeros((n_total - n_tokens,), jnp.int32)])
    grid = (n_total // t_tokens,)

    out_spec = pl.BlockSpec((t_tokens, d_pad), lambda t, ids_ref: (t, 0))

    if use_vmem_table:
        kernel = functools.partial(_gather_vmem_kernel, n_tokens)
        # index_map always (0, 0): table loaded once, resident across the grid.
        in_specs = [pl.BlockSpec((vocab_size, d_pad), lambda t, ids_ref: (0, 0))]
        scratch_shapes = []
    else:
        kernel = functools.partial(_gather_hbm_kernel, n_tokens)
        in_specs = [pl.BlockSpec(memory_space=pl.ANY)]   # table stays in HBM
        scratch_shapes = [pltpu.SemaphoreType.DMA((1,))]

    out = pl.pallas_call(
        kernel,
        out_shape=jax.ShapeDtypeStruct((n_total, d_pad), weight.dtype),
        grid_spec=pltpu.PrefetchScalarGridSpec(
            num_scalar_prefetch=1,                       # ids -> SMEM
            grid=grid,
            in_specs=in_specs,
            out_specs=out_spec,
            scratch_shapes=scratch_shapes,
        ),
        compiler_params=pltpu.CompilerParams(
            dimension_semantics=("parallel",),           # independent token blocks
            vmem_limit_bytes=vmem_limit_bytes,
        ),
    )(ids, weight)
    return out[:n_tokens]


@functools.partial(
    jax.jit, static_argnames=("t_tokens", "vmem_table_max_bytes", "chunk_cap"))
def vocab_parallel_embedding(x, weight, *, t_tokens=None,
                             vmem_table_max_bytes=6 * 1024 * 1024,
                             chunk_cap=32768):
    """Forward of VocabParallelEmbedding (single model-parallel partition)."""
    vocab_size, embedding_dim = weight.shape
    dtype = weight.dtype
    itemsize = jnp.dtype(dtype).itemsize
    sub = _sublane_multiple(dtype)

    orig_shape = x.shape
    ids = x.reshape(-1).astype(jnp.int32)
    n_tokens = ids.shape[0]
    if n_tokens == 0:
        return jnp.zeros((*orig_shape, embedding_dim), dtype)

    # TODO(synk): torch.nn.functional.embedding raises on out-of-range ids;
    # here they are clamped to [0, V-1] instead (no device-side exception).
    ids = jnp.clip(ids, 0, vocab_size - 1)

    # Lane-dense embedding dim: pad columns to a multiple of 128 (sliced off).
    d_pad = _round_up(embedding_dim, 128)
    w = weight if d_pad == embedding_dim else jnp.pad(
        weight, ((0, 0), (0, d_pad - embedding_dim)))

    table_bytes = vocab_size * d_pad * itemsize
    use_vmem_table = table_bytes <= vmem_table_max_bytes

    # Token tile selection (all static):
    #  - VMEM budget: (possibly double-buffered) resident table + 2x output
    #    block must stay well under the scoped limit on every generation.
    #  - dtype-aware sublane multiple keeps the output block layout dense.
    #  - cap so the grid keeps >= 2 blocks (v7x has 2 TensorCores).
    vmem_budget = 24 * 1024 * 1024
    row_bytes = d_pad * itemsize
    avail = vmem_budget - (2 * table_bytes if use_vmem_table else 0)
    t_by_vmem = max(sub, _round_down(max(avail, 0) // (2 * row_bytes), sub))
    if n_tokens >= 2 * sub:
        t_by_grid = max(sub, _round_down(_round_up(n_tokens, sub) // 2, sub))
    else:
        t_by_grid = sub
    if t_tokens is None:
        t_tokens = max(sub, min(512, t_by_vmem, t_by_grid))
    assert t_tokens % sub == 0, (
        f"t_tokens ({t_tokens}) must be a multiple of the "
        f"{jnp.dtype(dtype).name} sublane tile ({sub})")

    # 32 MiB is <= physical VMEM on v5e/v6e (128 MiB) and v7x (64 MiB) and
    # above v5e's 16 MiB default scoped limit; usage is budgeted to ~24 MiB.
    vmem_limit_bytes = 32 * 1024 * 1024

    # Chunk very long sequences so the scalar-prefetched ids (1-D int32 in
    # SMEM, padded to a power of two in bytes) stay comfortably within SMEM.
    chunk_cap = _round_up(max(chunk_cap, t_tokens), t_tokens)
    chunks = []
    for start in range(0, n_tokens, chunk_cap):
        chunks.append(_embed_tokens(
            ids[start:start + chunk_cap], w,
            t_tokens=t_tokens, use_vmem_table=use_vmem_table,
            vmem_limit_bytes=vmem_limit_bytes))
    out = chunks[0] if len(chunks) == 1 else jnp.concatenate(chunks, axis=0)

    out = out[:, :embedding_dim]
    return out.reshape(*orig_shape, embedding_dim)


def init_embedding_weight(key, num_embeddings, embedding_dim, dtype=jnp.float32):
    """Deterministic xavier_normal_ init: std = sqrt(2 / (fan_in + fan_out))."""
    std = (2.0 / (num_embeddings + embedding_dim)) ** 0.5
    return (jax.random.normal(key, (num_embeddings, embedding_dim)) * std).astype(dtype)


if __name__ == "__main__":
    num_embeddings = 256   # vocab size
    embedding_dim = 128    # hidden size
    batch, seq = 2, 8

    key = jax.random.PRNGKey(0)
    k_w, k_x = jax.random.split(key)

    weight = init_embedding_weight(k_w, num_embeddings, embedding_dim)
    x = jax.random.randint(k_x, (batch, seq), 0, num_embeddings, dtype=jnp.int32)

    ref = weight[x]   # plain JAX embedding lookup (== F.embedding)

    # Path 1: VMEM-resident table (default for this small 128 KiB table).
    # Auto tile -> 8 tokens/block -> 2 grid blocks exercised.
    out_vmem = jax.block_until_ready(vocab_parallel_embedding(x, weight))
    assert out_vmem.shape == (batch, seq, embedding_dim), out_vmem.shape
    assert out_vmem.dtype == weight.dtype, out_vmem.dtype
    assert jnp.allclose(out_vmem, ref), "VMEM-table path mismatch vs reference"

    # Path 2: HBM row-gather (forced, exercises the large-table path).
    out_hbm = jax.block_until_ready(
        vocab_parallel_embedding(x, weight, vmem_table_max_bytes=0))
    assert out_hbm.shape == (batch, seq, embedding_dim), out_hbm.shape
    assert out_hbm.dtype == weight.dtype, out_hbm.dtype
    assert jnp.allclose(out_hbm, ref), "HBM-gather path mismatch vs reference"

    print("KERNEL_OK")
</pallas_src>

<mosaic_0001>
module attributes {stable_mosaic.version = 11 : i64} {
  func.func @_gather_vmem_kernel(%arg0: i32, %arg1: memref<16xi32, #tpu.memory_space<smem>>, %arg2: memref<256x128xf32, #tpu.memory_space<vmem>>, %arg3: memref<8x128xf32, #tpu.memory_space<vmem>>) attributes {dimension_semantics = [#tpu.dimension_semantics<parallel>], iteration_bounds = array<i64: 2>, scalar_prefetch = 1 : i64, scratch_operands = 0 : i64, tpu.core_type = #tpu.core_type<tc>, window_params = [{pipeline_mode = #tpu.pipeline_mode<synchronous>, transform_indices = @transform_0, window_bounds = array<i64: 256, 128>}, {transform_indices = @transform_1, window_bounds = array<i64: 8, 128>}]} {
    %c8_i32 = arith.constant 8 : i32
    %0 = arith.muli %arg0, %c8_i32 : i32
    %c16_i32 = arith.constant 16 : i32
    %1 = arith.subi %c16_i32, %0 : i32
    %c8_i32_0 = arith.constant 8 : i32
    %2 = arith.minsi %c8_i32_0, %1 : i32
    %c0_i32 = arith.constant 0 : i32
    %c0_i32_1 = arith.constant 0 : i32
    %3 = arith.subi %2, %c0_i32_1 : i32
    %4 = arith.addi %c0_i32_1, %3 : i32
    %c1_i32 = arith.constant 1 : i32
    scf.for %arg4 = %c0_i32_1 to %4 step %c1_i32  : i32 {
      %5 = arith.addi %0, %arg4 : i32
      %6 = arith.index_cast %5 : i32 to index
      %7 = memref.load %arg1[%6] : memref<16xi32, #tpu.memory_space<smem>>
      %8 = arith.index_cast %7 : i32 to index
      %c0 = arith.constant 0 : index
      %9 = vector.load %arg2[%8, %c0] : memref<256x128xf32, #tpu.memory_space<vmem>>, vector<1x128xf32>
      %10 = arith.index_cast %arg4 : i32 to index
      %c0_2 = arith.constant 0 : index
      %11 = vector.load %arg3[%10, %c0_2] : memref<8x128xf32, #tpu.memory_space<vmem>>, vector<1x128xf32>
      tpu.vector_store %arg3[%10, %c0_2], %9 {strides = array<i32>} : memref<8x128xf32, #tpu.memory_space<vmem>>, vector<1x128xf32>,
    }
    return
  }
  func.func @transform_0(%arg0: i32, %arg1: memref<16xi32, #tpu.memory_space<smem>>) -> (i32, i32) {
    %c0_i32 = arith.constant 0 : i32
    %c0_i32_0 = arith.constant 0 : i32
    %c0_i32_1 = arith.constant 0 : i32
    return %c0_i32, %c0_i32_0 : i32, i32
  }
  func.func @transform_1(%arg0: i32, %arg1: memref<16xi32, #tpu.memory_space<smem>>) -> (i32, i32) {
    %c0_i32 = arith.constant 0 : i32
    %c0_i32_0 = arith.constant 0 : i32
    return %arg0, %c0_i32 : i32, i32
  }
}

</mosaic_0001>

<bundles_post_ra>
// kernel: vocab_parallel_embedding.1
= control target key start
LH: loop header
LB: loop body
LE: loop exit
PB: predicated region body
PF: predicated region fallthrough
CT: control target
= control target key end

     0   :  { %s527_s0 = inlined_call_operand.vmem [shape: s32[16], index: 0, kind: input, shape index: {}]   ;;  %s528_s1 = inlined_call_operand.hbm [shape: f32[256,128], index: 1, kind: input, shape index: {}]   ;;  %s529_s2 = inlined_call_operand.hbm [shape: f32[16,128], index: 2, kind: output, shape index: {}]  }
   0x1   :  { %s7_s11 = sshll.u32 %s527_s0, 4  ;;  %s8_s11 = int_to_ptr.vmem [resolvable:$true] %s7_s11 }
   0x2   :  { %s289_s12 = scalar_lea.vmem %s8_s11, 16  ;;  %p294_p1 = scmp.lt.s32.totalorder %s8_s11, %s8_s11 }
   0x3   :  { %p290_p0 = scmp.ne.s32.totalorder %s8_s11, %s289_s12  ;;  %p295_p2 = scmp.lt.s32.totalorder %s289_s12, %s289_s12 }
   0x5   :  { %p296_p3 = por %p295_p2, %p294_p1 }
   0x7   :  { %p297_p4 = pnand %p296_p3, %p290_p0 }
   0x9   :  { %300 = shalt.err (!%p297_p4)  }
   0xa   :  { %s403_s13 = smov [#allocation3]  }
   0xb   :  { %10 = dma.vmem_to_smem %s8_s11, 16, %s403_s13, [#allocation2] }
   0xc   :  { %373 = dma.done.wait [#allocation2], 16 }
   0xd   :  { %374 = vsyncadd [#allocation2], 4294967280 }
   0xe   :  { %12 = sfence }
   0xf   :  { %13 = vsyncpa [#allocation5], 0 }
  0x10   :  { %14 = vsyncpa [#allocation6], 0 }
  0x11   :  { %16 = vsyncpa [#allocation6 + $0x1], 0  ;;  %s426_s14 = smov 0   ;;  %s428_s15 = smov 0  }
  0x12   :  { %s430_s0 = smov 0   ;;  %s432_s16 = smov 0  }
  0x13 LB: > { %s447_s17 = sadd.s32 4294967295, %s397_s16   ;;  %s213_s18 = sadd.s32 4294967294, %s397_s16   ;;  %s397_s16 = sphi %s432_s16, %s537_s16   ;;  %s393_s0 = sphi %s430_s0, %s536_s0   ;;  %s389_s15 = sphi %s428_s15, %s535_s15   ;;  %s385_s14 = sphi %s426_s14, %s534_s14  }
  0x14   : > { %s451_s19 = sadd.s32 1, %s397_s16   ;;  %s50_s20 = sadd.s32 1, %s393_s0 }
  0x15   : > { %s47_s21 = ssub.s32 %s397_s16, %s451_s19  ;;  %p60_p5 = scmp.ne.s32.totalorder %s393_s0, %s389_s15 }
  0x16   : > { %p48_p6 = scmp.eq.s32.totalorder %s47_s21, 0  ;;  %p61_p7 = scmp.eq.s32.totalorder %s447_s17, 1 }
  0x17   : > { %p66_p8 = scmp.ne.s32.totalorder %s389_s15, %s385_s14  ;;  %p67_p9 = scmp.eq.s32.totalorder %s213_s18, 1 }
  0x18   : > { %s462_s22 = scalar_select %p48_p6, %s393_s0, %s50_s20  }
  0x19   : > { %p464_p10 = por %p61_p7, %p60_p5  ;;  %p468_p11 = por %p67_p9, %p66_p8 }
  0x1a   : > { %p214_p12 = scmp.ge.s32.totalorder %s397_s16, 1  ;;  %p74_p13 = scmp.lt.s32.totalorder %s397_s16, 3 }
  0x1b   : > { %s531_s24 = scalar_select %p468_p11, 1, 0 }
  0x1c   : > { %p242_p0 = scmp.eq.s32.totalorder %s447_s17, 0  ;;  %p475_p1 = pnand %p214_p12, %p74_p13 }
  0x1d   : > { %s404_s26 = smov [#allocation4]  }
  0x1e   : > { %s86_s27 = sshll.u32 %s404_s26, 4  ;;  %p234_p2 = pneg %p475_p1  ;;  %s87_s27 = int_to_ptr.vmem [resolvable:$true] %s86_s27 }
  0x1f   : > { %s312_s28 = scalar_lea.vmem %s87_s27, 4096  ;;  %p320_p8 = scmp.lt.s32.totalorder %s87_s27, %s87_s27 }
  0x20   : > { %p235_p3 = pnand %p242_p0, %p234_p2  ;;  %p313_p5 = scmp.ne.s32.totalorder %s87_s27, %s312_s28 }
  0x21   : > { %p321_p9 = scmp.lt.s32.totalorder %s312_s28, %s312_s28 }
  0x22   : > { %p303_p4 = pneg %p235_p3 }
  0x23   : > { %p322_p11 = por %p321_p9, %p320_p8 }
  0x24   : > { %p315_p6 = pnand %p313_p5, %p303_p4 }
  0x26   : > { %p316_p7 = pneg %p315_p6 }
  0x28   : > { %p323_p12 = pnand %p322_p11, %p316_p7 }
  0x2a   : > { %326 = shalt.err (!%p323_p12)
}
  0x2b   : > { %s405_s29 = smov 128   ;;  %s406_s30 = smov 8  }
  0x2c   : > { %237 = dma.hbm_to_vmem [thread:$0]  (!%p235_p3), %s528_s1, 4096, %s87_s27, [#allocation5], %s405_s29, %s405_s29, %s406_s30  }
  0x2d   : > { %102 = sbr.rel (%p475_p1) target bundleno = 94 (0x5e), region = 24 }
  0x32   : > { %376 = dma.done.wait (%p242_p0), [#allocation5], 4096  }
  0x33   : > { %378 = vsyncadd (%p242_p0), [#allocation5], 4294963200  ;;  %s114_s5 = sand.u32 1, %s389_s15   ;;  %s219_s6 = sshll.u32 %s447_s17, 3 }
  0x34   : > { %s218_s7 = sshll.u32 %s114_s5, 3  ;;  %s118_s8 = ssub.s32 16, %s219_s6 }
  0x35   : > { %p119_p11 = scmp.lt.s32.totalorder %s118_s8, 8  ;;  %s116_s10 = scalar_lea.vmem [#allocation7], %s218_s7 }
  0x36   : > { %p225_p13 = scmp.le.s32.totalorder %s118_s8, 0 }
  0x37   : > { %s120_s9 = scalar_select %p119_p11, %s118_s8, 8 }
  0x38   : > { %186 = sbr.rel (%p225_p13) target bundleno = 71 (0x47), region = 64  ;;  %s399_s11 = smov (!%p225_p13), 0  }
  0x3d LB: >> { %s127_s12 = sadd.s32 %s401_s11, %s219_s6  ;;  %s131_s18 = scalar_lea.vmem %s116_s10, %s401_s11 [#allocation7]  ;;  %s401_s11 = sphi %s399_s11, %s124_s11  }
  0x3e   : >> { %s128_s13 = sld [smem:[#allocation3 + %s127_s12]]  ;;  %s124_s11 = sadd.s32 1, %s401_s11  }
  0x3f   : >> { %p123_p0 = scmp.ge.s32.totalorder %s124_s11, %s120_s9 }
  0x42   : > { %126 = sbr.rel (!%p123_p0) target bundleno = 61 (0x3d), region = 70 }
  0x44   : >> { %s129_s20 = scalar_lea.vmem [#allocation4], %s128_s13 }
  0x45   : >> { %v130_v0 = vld [vmem:[%s129_s20] sm:$0x1] }
  0x46   : >> { %132 = vst [vmem:[%s131_s18] sm:$0x1] %v130_v0 }
  0x47 PF: > { %s222_s21 = sshll.u32 %s447_s17, 7  ;;  %s147_s28 = sshll.u32 %s116_s10, 4  ;;  %s148_s28 = int_to_ptr.vmem [resolvable:$true] %s147_s28 }
  0x48   : > { %s145_s27 = scalar_lea.hbm %s529_s2, %s222_s21  ;;  %s134_s29 = scalar_lea.sflag [#allocation6], %s114_s5 }
  0x49   : > { %s327_s30 = scalar_lea.vmem %s148_s28, 128  ;;  %s407_s3 = smov [#allocation7]  }
  0x4a   : > { %p328_p1 = scmp.ne.s32.totalorder %s148_s28, %s327_s30  ;;  %s331_s4 = sshll.u32 %s407_s3, 4  ;;  %s332_s4 = int_to_ptr.vmem [resolvable:$false] %s331_s4 }
  0x4b   : > { %s333_s7 = scalar_lea.vmem %s332_s4, 256  ;;  %p334_p4 = scmp.lt.s32.totalorder %s148_s28, %s332_s4 }
  0x4c   : > { %p329_p2 = pnand %p328_p1, %p464_p10  ;;  %p335_p5 = scmp.lt.s32.totalorder %s333_s7, %s327_s30 }
  0x4e   : > { %p330_p3 = pneg %p329_p2  ;;  %p336_p6 = por %p335_p5, %p334_p4 }
  0x50   : > { %p337_p7 = pnand %p336_p6, %p330_p3 }
  0x52   : > { %340 = shalt.err (!%p337_p7)
}
  0x53   : > { %s341_s17 = scalar_lea.hbm %s145_s27, 128  ;;  %s345_s8 = scalar_lea.hbm %s529_s2, 256 }
  0x54   : > { %p342_p8 = scmp.ne.s32.totalorder %s145_s27, %s341_s17  ;;  %p346_p11 = scmp.lt.s32.totalorder %s145_s27, %s529_s2 }
  0x55   : > { %p347_p13 = scmp.lt.s32.totalorder %s345_s8, %s341_s17 }
  0x56   : > { %p343_p9 = pnand %p342_p8, %p464_p10 }
  0x57   : > { %p348_p0 = por %p347_p13, %p346_p11 }
  0x58   : > { %p344_p12 = pneg %p343_p9 }
  0x5a   : > { %p349_p1 = pnand %p348_p0, %p344_p12 }
  0x5c   : > { %352 = shalt.err (!%p349_p1)
}
  0x5d   : > { %232 = dma.vmem_to_hbm [thread:$0]  (%p464_p10), %s148_s28, 128, %s145_s27, %s134_s29  }
  0x5e PF: > { %p244_p2 = scmp.ge.s32.totalorder %s397_s16, 2  ;;  %s159_s11 = sand.u32 1, %s385_s14  }
  0x5f   : > { %p533_p3 = scmp.ne.s32.totalorder %s531_s24, 0  ;;  %s160_s12 = scalar_lea.sflag [#allocation6], %s159_s11 }
  0x61   : > { %p239_p4 = pnand %p244_p2, %p533_p3 }
  0x63   : > { %p240_p5 = pneg %p239_p4 }
  0x65   : > { %380 = dma.done.wait (%p240_p5), %s160_s12, 128  }
  0x66   : > { %382 = vsyncadd (%p240_p5), %s160_s12, 4294967168  ;;  %p19_p6 = scmp.ge.s32.totalorder %s451_s19, 4   ;;  %s534_s14 = smov %s389_s15 }
  0x67   : > { %s535_s15 = smov %s393_s0  ;;  %s536_s0 = smov %s462_s22 }
  0x68   : > { %s537_s16 = smov %s451_s19  ;;  %21 = sbr.rel (!%p19_p6) target bundleno = 19 (0x13), region = 81 }
  0x6d   :  { %165 = vsyncpa [#allocation5], 1 }
  0x6e   :  { %167 = vsyncpa [#allocation5 + $0x1], 1 }
  0x6f   :  { %168 = vsyncpa [#allocation6], 1 }
  0x70   :  { %170 = vsyncpa [#allocation6 + $0x1], 1 }

</bundles_post_ra>
